<compile_context>
chip_gen: v5e
topology: v5e:2x2
jax: 0.10.0
libtpu: 0.0.40
codegen_flags: <defaults>
</compile_context>

<pallas_src>
import functools
import math

import jax
import jax.numpy as jnp
from jax.experimental import pallas as pl
from jax.experimental.pallas import tpu as pltpu


def build_pe_table(d_model: int, seq_len: int, dtype=jnp.float32) -> jax.Array:
    """Deterministic sin/cos positional-encoding buffer, shape (1, seq_len, d_model)."""
    position = jnp.arange(seq_len, dtype=jnp.float32)[:, None]               # (L, 1)
    div_term = jnp.exp(
        jnp.arange(0, d_model, 2, dtype=jnp.float32) * (-math.log(10000.0) / d_model)
    )                                                                         # (ceil(D/2),)
    angles = position * div_term                                              # (L, ceil(D/2))
    pe = jnp.zeros((seq_len, d_model), dtype=jnp.float32)
    pe = pe.at[:, 0::2].set(jnp.sin(angles))
    pe = pe.at[:, 1::2].set(jnp.cos(angles)[:, : d_model // 2])               # odd-d safe
    return pe[None].astype(dtype)                                             # (1, L, D)


# ----------------------------- kernels ---------------------------------------

def _pe_add_kernel(x_ref, pe_ref, o_ref):
    # x_ref: (RB, CB), pe_ref: (1, CB) -> broadcast add over rows.
    o_ref[...] = x_ref[...] + pe_ref[...]


def _pe_add_dropout_kernel(x_ref, pe_ref, bits_ref, o_ref, *, threshold: int, scale: float):
    y = x_ref[...] + pe_ref[...]
    # Inverted dropout with an integer threshold: drop iff bits < threshold.
    keep = bits_ref[...] >= jnp.uint32(threshold)
    o_ref[...] = jnp.where(keep, y * scale, jnp.zeros_like(y))


# ----------------------------- tiling helpers ---------------------------------

_ROW_Q, _COL_Q = 8, 128
_MAX_ROWS, _MAX_COLS = 128, 4096          # ~2 MiB f32 tile -> safe on all generations


def _block_cols(F: int) -> int:
    if F % _COL_Q == 0 and F > _MAX_COLS:
        return _MAX_COLS                  # 128-multiple tile, lane-dense
    # Full extent: always a legal block shape (and lane-dense whenever F%128==0,
    # which holds for typical (L, d_model) configs).
    return F


def _block_rows(B: int) -> int:
    if B > _MAX_ROWS:
        return _MAX_ROWS                  # multiple of 8
    return B                              # full extent: always legal


# ----------------------------- wrapper ----------------------------------------

def positional_encoding_forward(
    x: jax.Array,
    pe: jax.Array,
    *,
    dropout_p: float = 0.1,
    training: bool = False,
    rng_key: jax.Array | None = None,
    donate_x: bool = False,
) -> jax.Array:
    """x: (B, L, D); pe: (1, max_L, D) with max_L >= L. Returns dropout(x + pe[:, :L])."""
    B, L, D = x.shape
    F = L * D

    # Lane-dense 2-D views. Flattening pe[:, :L, :] keeps element alignment with
    # the flattened x rows (both row-major over (position, d_model)).
    x2 = x.reshape(B, F)
    pe2 = pe[:, :L, :].reshape(1, F)
    if pe2.dtype != x.dtype:
        pe2 = pe2.astype(x.dtype)

    rb = _block_rows(B)
    cb = _block_cols(F)
    # Column-tile axis OUTER, row-tile axis INNER -> pe block index constant
    # across the inner loop, so the PE table is fetched once per column tile.
    grid = (pl.cdiv(F, cb), pl.cdiv(B, rb))

    x_spec = pl.BlockSpec((rb, cb), lambda f, b: (b, f))
    pe_spec = pl.BlockSpec((1, cb), lambda f, b: (0, f))
    bits_spec = pl.BlockSpec((rb, cb), lambda f, b: (b, f))
    out_spec = pl.BlockSpec((rb, cb), lambda f, b: (b, f))
    cparams = pltpu.CompilerParams(dimension_semantics=("parallel", "parallel"))
    aliases = {0: 0} if donate_x else {}

    use_dropout = training and dropout_p > 0.0
    if not use_dropout:
        out2 = pl.pallas_call(
            _pe_add_kernel,
            out_shape=jax.ShapeDtypeStruct((B, F), x.dtype),
            grid=grid,
            in_specs=[x_spec, pe_spec],
            out_specs=out_spec,
            compiler_params=cparams,
            input_output_aliases=aliases,
        )(x2, pe2)
        return out2.reshape(B, L, D)

    if dropout_p >= 1.0:
        return jnp.zeros_like(x)
    if rng_key is None:
        rng_key = jax.random.PRNGKey(0)

    threshold = min(int(round(float(dropout_p) * 2.0 ** 32)), 2 ** 32 - 1)
    scale = 1.0 / (1.0 - float(dropout_p))
    # Portable RNG: draw the bits once in the wrapper (works on TPU and in
    # interpret mode); the kernel only does the integer compare + select.
    bits = jax.random.bits(rng_key, (B, F), dtype=jnp.uint32)

    kernel = functools.partial(_pe_add_dropout_kernel, threshold=threshold, scale=scale)
    out2 = pl.pallas_call(
        kernel,
        out_shape=jax.ShapeDtypeStruct((B, F), x.dtype),
        grid=grid,
        in_specs=[x_spec, pe_spec, bits_spec],
        out_specs=out_spec,
        compiler_params=cparams,
        input_output_aliases=aliases,
    )(x2, pe2, bits)
    return out2.reshape(B, L, D)


# ----------------------------- self-test ---------------------------------------

if __name__ == "__main__":
    # Module config: d_model=32, max seq_len=16, dropout=0.1
    d_model, max_seq_len, dropout_p = 32, 16, 0.1
    batch, seq = 2, 8

    key = jax.random.PRNGKey(0)
    x_key, drop_key = jax.random.split(key)
    x = jax.random.normal(x_key, (batch, seq, d_model), dtype=jnp.float32)
    pe = build_pe_table(d_model, max_seq_len)

    ref = x + pe[:, :seq, :]

    # --- eval mode: dropout is identity, must match x + pe exactly ---
    out_eval = positional_encoding_forward(x, pe, dropout_p=dropout_p, training=False)
    jax.block_until_ready(out_eval)
    assert out_eval.shape == x.shape
    assert jnp.allclose(out_eval, ref, atol=1e-6, rtol=1e-6), "eval-mode mismatch"

    # --- training mode: reproduce the exact mask from the same key/threshold ---
    out_train = positional_encoding_forward(
        x, pe, dropout_p=dropout_p, training=True, rng_key=drop_key
    )
    jax.block_until_ready(out_train)
    threshold = min(int(round(dropout_p * 2.0 ** 32)), 2 ** 32 - 1)
    bits = jax.random.bits(drop_key, (batch, seq * d_model), dtype=jnp.uint32)
    keep = (bits >= jnp.uint32(threshold)).reshape(batch, seq, d_model)
    expected = jnp.where(keep, ref / (1.0 - dropout_p), 0.0)
    assert jnp.allclose(out_train, expected, atol=1e-5, rtol=1e-5), (
        "training-mode dropout mismatch"
    )

    print("KERNEL_OK")
</pallas_src>

<mosaic_0001>
module attributes {stable_mosaic.version = 11 : i64} {
  func.func @_pe_add_kernel(%arg0: i32, %arg1: i32, %arg2: memref<2x256xf32, #tpu.memory_space<vmem>>, %arg3: memref<1x256xf32, #tpu.memory_space<vmem>>, %arg4: memref<2x256xf32, #tpu.memory_space<vmem>>) attributes {dimension_semantics = [#tpu.dimension_semantics<parallel>, #tpu.dimension_semantics<parallel>], iteration_bounds = array<i64: 1, 1>, scalar_prefetch = 0 : i64, scratch_operands = 0 : i64, tpu.core_type = #tpu.core_type<tc>, window_params = [{transform_indices = @transform_0, window_bounds = array<i64: 2, 256>}, {transform_indices = @transform_1, window_bounds = array<i64: 1, 256>}, {transform_indices = @transform_2, window_bounds = array<i64: 2, 256>}]} {
    %c0 = arith.constant 0 : index
    %c0_0 = arith.constant 0 : index
    %0 = vector.load %arg2[%c0, %c0_0] : memref<2x256xf32, #tpu.memory_space<vmem>>, vector<2x256xf32>
    %c0_1 = arith.constant 0 : index
    %c0_2 = arith.constant 0 : index
    %1 = vector.load %arg3[%c0_1, %c0_2] : memref<1x256xf32, #tpu.memory_space<vmem>>, vector<1x256xf32>
    %2 = vector.broadcast %1 : vector<1x256xf32> to vector<2x256xf32>
    %3 = arith.addf %0, %2 : vector<2x256xf32>
    %c0_3 = arith.constant 0 : index
    %c0_4 = arith.constant 0 : index
    %4 = vector.load %arg4[%c0_3, %c0_4] : memref<2x256xf32, #tpu.memory_space<vmem>>, vector<2x256xf32>
    tpu.vector_store %arg4[%c0_3, %c0_4], %3 {strides = array<i32>} : memref<2x256xf32, #tpu.memory_space<vmem>>, vector<2x256xf32>,
    return
  }
  func.func @transform_0(%arg0: i32, %arg1: i32) -> (i32, i32) {
    %c0_i32 = arith.constant 0 : i32
    return %arg1, %arg0 : i32, i32
  }
  func.func @transform_1(%arg0: i32, %arg1: i32) -> (i32, i32) {
    %c0_i32 = arith.constant 0 : i32
    %c0_i32_0 = arith.constant 0 : i32
    return %c0_i32, %arg0 : i32, i32
  }
  func.func @transform_2(%arg0: i32, %arg1: i32) -> (i32, i32) {
    %c0_i32 = arith.constant 0 : i32
    return %arg1, %arg0 : i32, i32
  }
}

</mosaic_0001>

<bundles_post_ra>
// kernel: tpu_custom_call.1
= control target key start
LH: loop header
LB: loop body
LE: loop exit
PB: predicated region body
PF: predicated region fallthrough
CT: control target
= control target key end

     0   :  { %7 = vsyncpa [#allocation3], 0  ;;  %s177_s0 = inlined_call_operand.hbm [shape: f32[2,256], index: 0, kind: input, shape index: {}]   ;;  %s178_s1 = inlined_call_operand.hbm [shape: f32[1,256], index: 1, kind: input, shape index: {}]   ;;  %s179_s2 = inlined_call_operand.hbm [shape: f32[2,256], index: 2, kind: output, shape index: {}]  }
   0x1   :  { %8 = vsyncpa [#allocation6], 0 }
   0x2   :  { %9 = vsyncpa [#allocation4], 0  ;;  %s15_s11 = sshll.u32 %s177_s0, 4  ;;  %s150_s12 = smov [#allocation2]   ;;  %s16_s11 = int_to_ptr.hbm [resolvable:$true] %s15_s11 }
   0x3   :  { %s17_s13 = sshll.u32 %s150_s12, 4  ;;  %s26_s16 = sshll.u32 %s178_s1, 4  ;;  %s18_s13 = int_to_ptr.vmem [resolvable:$true] %s17_s13  ;;  %s27_s16 = int_to_ptr.hbm [resolvable:$true] %s26_s16 }
   0x4   :  { %20 = dma.hbm_to_vmem [thread:$0]  %s16_s11, 64, %s18_s13, [#allocation3]  }
   0x5   :  { %s151_s17 = smov [#allocation5]  }
   0x6   :  { %s28_s18 = sshll.u32 %s151_s17, 4  ;;  %s29_s18 = int_to_ptr.vmem [resolvable:$true] %s28_s18 }
   0x7   :  { %31 = dma.hbm_to_vmem [thread:$0]  %s27_s16, 32, %s29_s18, [#allocation6]  }
   0x8   :  { %144 = dma.done.wait [#allocation3], 64  }
   0x9   :  { %145 = vsyncadd [#allocation3], 4294967232 }
   0xa   :  { %146 = dma.done.wait [#allocation6], 32  }
   0xb   :  { %147 = vsyncadd [#allocation6], 4294967264  ;;  %v41_v0 = vld [vmem:[#allocation5] sm:$0x3]  ;;  %vm46_vm0 = vcmask 1041408   ;;  %s152_s0 = smov [#allocation7]  }
   0xc   :  { %v43_v1 = vperm.slane %v41_v0, 0  ;;  %v44_v2 = vperm.slane %v41_v0, 1  ;;  %v40_v3 = vld [vmem:[#allocation2] sm:$0xf]  ;;  %s56_s19 = sshll.u32 %s152_s0, 4  ;;  %s58_s21 = sshll.u32 %s179_s2, 4  ;;  %s57_s19 = int_to_ptr.vmem [resolvable:$true] %s56_s19  ;;  %s59_s21 = int_to_ptr.hbm [resolvable:$true] %s58_s21 }
   0xe   :  { %v45_v4 = vrot.slane %v44_v2, 6 }
  0x10   :  { %v47_v5 = vsel %vm46_vm0, %v43_v1, %v45_v4 }
  0x11   :  { %v49_v6 = vadd.f32 %v47_v5, %v40_v3 }
  0x13   :  { %50 = vst [vmem:[#allocation7] sm:$0xf] %v49_v6 }
  0x14   :  { %61 = dma.vmem_to_hbm [thread:$0]  %s57_s19, 64, %s59_s21, [#allocation4]  }
  0x15   :  { %148 = dma.done.wait [#allocation4], 64  }
  0x16   :  { %149 = vsyncadd [#allocation4], 4294967232 }
  0x17   :  { %66 = vsyncpa [#allocation3], 1 }
  0x18   :  { %67 = vsyncpa [#allocation6], 1 }
  0x19   :  { %68 = vsyncpa [#allocation4], 1 }

</bundles_post_ra>
